<compile_context>
chip_gen: v6e
topology: v6e:2x2x1
jax: 0.10.0
libtpu: 0.0.40
codegen_flags: <defaults>
</compile_context>

<pallas_src>
import functools

import jax
import jax.numpy as jnp
from jax import lax
from jax.experimental import pallas as pl
from jax.experimental.pallas import tpu as pltpu


def _round_up(x, m):
    return (x + m - 1) // m * m


def _rnn_chunk_kernel(x_ref, wih_ref, whh_ref, b_ref, wfc_ref, bfc_ref,
                      out_ref, xw_ref, h_ref, *, chunk_len, batch_pad):
    """One time-chunk of the recurrence.

    x_ref:   (T_c * B_pad, I)   time-major rows (row = t * B_pad + b)
    wih_ref: (I, H_pad)         whh_ref: (H_pad, H_pad)
    b_ref:   (1, H_pad)         (= b_ih + b_hh, zero in padded lanes)
    wfc_ref: (H_pad, O_pad)     bfc_ref: (1, O_pad)
    out_ref: (B_pad, O_pad)     lane-dense output slab
    xw_ref:  VMEM (T_c * B_pad, H_pad) scratch for the input projection
    h_ref:   VMEM (B_pad, H_pad) hidden state carried across grid steps
    """
    c = pl.program_id(0)

    @pl.when(c == 0)
    def _():
        h_ref[...] = jnp.zeros_like(h_ref)

    # (1) One MXU GEMM for the input projection of every timestep in this
    #     chunk; RNN bias folded in exactly once (hoisted off the serial
    #     chain).
    xw_ref[...] = (jnp.dot(x_ref[...], wih_ref[...],
                           preferred_element_type=jnp.float32)
                   + b_ref[...])

    # Keep the recurrent weight live across the whole chunk.
    # TODO(synk): pltpu.matmul_push_rhs / matmul_acc_lhs / matmul_pop could
    # pin W_hh in the MXU staging registers across all steps; kept as jnp.dot
    # since Mosaic hoists the loop-invariant RHS and the explicit MXU API is
    # fragile inside fori_loop.
    whh = whh_ref[...]

    # (2) Serial recurrence — the carry h_t depends on h_{t-1}; never
    #     parallelize the time axis.  Per-step load is a unit-stride,
    #     8-row-aligned contiguous slice (single unmasked vld).
    def step(t, h):
        row0 = pl.multiple_of(t * batch_pad, batch_pad)
        x_t = xw_ref[pl.ds(row0, batch_pad), :]                 # (B_pad, H_pad)
        return jnp.tanh(x_t + jnp.dot(h, whh,
                                      preferred_element_type=jnp.float32))

    unroll = True if chunk_len <= 8 else 4
    h = lax.fori_loop(0, chunk_len, step, h_ref[...], unroll=unroll)
    h_ref[...] = h

    # (3) Final Linear on the last hidden state, only on the last chunk
    #     (output block is resident across the "arbitrary" axis -> single
    #     lane-dense writeback at grid end).
    @pl.when(c == pl.num_programs(0) - 1)
    def _():
        out_ref[...] = (jnp.dot(h, wfc_ref[...],
                                preferred_element_type=jnp.float32)
                        + bfc_ref[...]).astype(out_ref.dtype)


def prepare_vanilla_rnn_params(w_ih, w_hh, b_ih, b_hh, w_fc, b_fc):
    """One-time parameter prep (transpose + zero-pad to TPU-friendly shapes).

    Call at parameter-load time, NOT per forward call, so the hot path has no
    extra XLA layout ops.
    w_ih: (H, I), w_hh: (H, H), b_ih/b_hh: (H,), w_fc: (O, H), b_fc: (O,).
    """
    H, I = w_ih.shape
    O = w_fc.shape[0]
    Hp = _round_up(H, 128)   # lane-dense hidden
    Op = _round_up(O, 128)   # lane-dense output
    f32 = jnp.float32
    wih_t = jnp.zeros((I, Hp), f32).at[:, :H].set(jnp.transpose(w_ih).astype(f32))
    whh_t = jnp.zeros((Hp, Hp), f32).at[:H, :H].set(jnp.transpose(w_hh).astype(f32))
    b_rnn = jnp.zeros((1, Hp), f32).at[0, :H].set((b_ih + b_hh).astype(f32))
    wfc_t = jnp.zeros((Hp, Op), f32).at[:H, :O].set(jnp.transpose(w_fc).astype(f32))
    bfc = jnp.zeros((1, Op), f32).at[0, :O].set(b_fc.astype(f32))
    return dict(wih_t=wih_t, whh_t=whh_t, b_rnn=b_rnn, wfc_t=wfc_t, bfc=bfc,
                hidden_size=H, output_size=O)


def vanilla_rnn_forward(x_btI, params, *, chunk_len=None):
    """x_btI: (B, T, I) float (batch_first, like PyTorch).
    Returns (B, O) = fc(final_hidden)."""
    B, T, I = x_btI.shape
    O = params["output_size"]
    Hp = params["whh_t"].shape[0]
    Op = params["wfc_t"].shape[1]
    Bp = _round_up(B, 8)      # sublane-aligned batch

    if chunk_len is None:
        chunk_len = next(c for c in (8, 4, 2, 1) if T % c == 0)
    assert T % chunk_len == 0, "chunk_len must divide T"
    n_chunks = T // chunk_len

    # Time-major layout + zero-pad batch to a sublane multiple.  Rows of x2d
    # for timestep t are [t*Bp, t*Bp + Bp) -> contiguous per-step loads.
    xt = jnp.transpose(x_btI, (1, 0, 2)).astype(jnp.float32)      # (T, B, I)
    xt = jnp.pad(xt, ((0, 0), (0, Bp - B), (0, 0)))               # (T, Bp, I)
    x2d = xt.reshape(T * Bp, I)

    flops = 2 * T * Bp * I * Hp + 2 * T * Bp * Hp * Hp + 2 * Bp * Hp * Op
    bytes_accessed = 4 * (T * Bp * I + I * Hp + Hp * Hp + Hp
                          + Hp * Op + Op + Bp * Op)
    cost = pl.CostEstimate(flops=flops,
                           transcendentals=T * Bp * Hp,
                           bytes_accessed=bytes_accessed)

    grid_spec = pltpu.PrefetchScalarGridSpec(
        num_scalar_prefetch=0,
        grid=(n_chunks,),                    # time chunks; recurrence inside
        in_specs=[
            # x: new block per chunk -> auto double-buffered DMA overlaps the
            # previous chunk's compute.
            pl.BlockSpec((chunk_len * Bp, I), lambda c: (c, 0)),
            # Weights/biases: constant index_map -> DMA'd once, resident.
            pl.BlockSpec((I, Hp), lambda c: (0, 0)),
            pl.BlockSpec((Hp, Hp), lambda c: (0, 0)),
            pl.BlockSpec((1, Hp), lambda c: (0, 0)),
            pl.BlockSpec((Hp, Op), lambda c: (0, 0)),
            pl.BlockSpec((1, Op), lambda c: (0, 0)),
        ],
        out_specs=pl.BlockSpec((Bp, Op), lambda c: (0, 0)),
        scratch_shapes=[
            pltpu.VMEM((chunk_len * Bp, Hp), jnp.float32),   # xw projection
            pltpu.VMEM((Bp, Hp), jnp.float32),               # carried hidden
        ],
    )

    # TODO(synk): for B >= 2 batch tiles, add a leading "parallel" batch-tile
    # grid axis (x laid out (nb, T, B_tile, I)) so v7x's two TensorCores take
    # independent sequences; degenerate at this toy B so omitted.
    out = pl.pallas_call(
        functools.partial(_rnn_chunk_kernel,
                          chunk_len=chunk_len, batch_pad=Bp),
        out_shape=jax.ShapeDtypeStruct((Bp, Op), jnp.float32),
        grid_spec=grid_spec,
        compiler_params=pltpu.CompilerParams(
            dimension_semantics=("arbitrary",)),  # serial carry: never "parallel"
        cost_estimate=cost,
    )(x2d, params["wih_t"], params["whh_t"], params["b_rnn"],
      params["wfc_t"], params["bfc"])

    return out[:B, :O]


def _reference(x_btI, w_ih, w_hh, b_ih, b_hh, w_fc, b_fc):
    """Pure-JAX reference matching torch.nn.RNN(tanh) + Linear semantics."""
    B, T, I = x_btI.shape
    H = w_hh.shape[0]
    h = jnp.zeros((B, H), jnp.float32)
    for t in range(T):
        x_t = x_btI[:, t, :]
        h = jnp.tanh(x_t @ w_ih.T + b_ih + h @ w_hh.T + b_hh)
    return h @ w_fc.T + b_fc


if __name__ == "__main__":
    # Small shapes consistent with the module's forward.
    B, T, I, H, O = 2, 8, 16, 32, 8

    key = jax.random.PRNGKey(0)
    keys = jax.random.split(key, 7)
    # Deterministic init, mimicking PyTorch's U(-1/sqrt(H), 1/sqrt(H))
    s = 1.0 / jnp.sqrt(jnp.float32(H))
    w_ih = jax.random.uniform(keys[0], (H, I), jnp.float32, -s, s)
    w_hh = jax.random.uniform(keys[1], (H, H), jnp.float32, -s, s)
    b_ih = jax.random.uniform(keys[2], (H,), jnp.float32, -s, s)
    b_hh = jax.random.uniform(keys[3], (H,), jnp.float32, -s, s)
    w_fc = jax.random.uniform(keys[4], (O, H), jnp.float32, -s, s)
    b_fc = jax.random.uniform(keys[5], (O,), jnp.float32, -s, s)

    x = jax.random.normal(keys[6], (B, T, I), jnp.float32)

    # One-time param prep (hoisted out of the per-forward hot path).
    params = prepare_vanilla_rnn_params(w_ih, w_hh, b_ih, b_hh, w_fc, b_fc)

    # chunk_len=4 -> grid=(2,) so the carried-hidden-state path is exercised.
    out = vanilla_rnn_forward(x, params, chunk_len=4)
    out = jax.block_until_ready(out)

    ref = _reference(x, w_ih, w_hh, b_ih, b_hh, w_fc, b_fc)
    assert out.shape == (B, O)
    assert jnp.allclose(out, ref, atol=1e-5, rtol=1e-5), "mismatch vs reference"

    print("KERNEL_OK")
</pallas_src>

<mosaic_0001>
module attributes {stable_mosaic.version = 11 : i64} {
  func.func @_rnn_chunk_kernel(%arg0: i32, %arg1: memref<32x16xf32, #tpu.memory_space<vmem>>, %arg2: memref<16x128xf32, #tpu.memory_space<vmem>>, %arg3: memref<128x128xf32, #tpu.memory_space<vmem>>, %arg4: memref<1x128xf32, #tpu.memory_space<vmem>>, %arg5: memref<128x128xf32, #tpu.memory_space<vmem>>, %arg6: memref<1x128xf32, #tpu.memory_space<vmem>>, %arg7: memref<8x128xf32, #tpu.memory_space<vmem>>, %arg8: memref<32x128xf32, #tpu.memory_space<vmem>>, %arg9: memref<8x128xf32, #tpu.memory_space<vmem>>) attributes {dimension_semantics = [#tpu.dimension_semantics<arbitrary>], iteration_bounds = array<i64: 2>, scalar_prefetch = 0 : i64, scratch_operands = 2 : i64, tpu.core_type = #tpu.core_type<tc>, window_params = [{transform_indices = @transform_0, window_bounds = array<i64: 32, 16>}, {pipeline_mode = #tpu.pipeline_mode<synchronous>, transform_indices = @transform_1, window_bounds = array<i64: 16, 128>}, {pipeline_mode = #tpu.pipeline_mode<synchronous>, transform_indices = @transform_2, window_bounds = array<i64: 128, 128>}, {pipeline_mode = #tpu.pipeline_mode<synchronous>, transform_indices = @transform_3, window_bounds = array<i64: 1, 128>}, {pipeline_mode = #tpu.pipeline_mode<synchronous>, transform_indices = @transform_4, window_bounds = array<i64: 128, 128>}, {pipeline_mode = #tpu.pipeline_mode<synchronous>, transform_indices = @transform_5, window_bounds = array<i64: 1, 128>}, {pipeline_mode = #tpu.pipeline_mode<synchronous>, transform_indices = @transform_6, window_bounds = array<i64: 8, 128>}]} {
    %c0_i32 = arith.constant 0 : i32
    %0 = arith.cmpi eq, %arg0, %c0_i32 : i32
    %1 = arith.extui %0 : i1 to i32
    %c0_i32_0 = arith.constant 0 : i32
    %2 = arith.cmpi ne, %1, %c0_i32_0 : i32
    scf.if %2 {
      %cst_28 = arith.constant 0.000000e+00 : f32
      %44 = vector.broadcast %cst_28 : f32 to vector<8x128xf32>
      %c0_29 = arith.constant 0 : index
      %c0_30 = arith.constant 0 : index
      %45 = vector.load %arg9[%c0_29, %c0_30] : memref<8x128xf32, #tpu.memory_space<vmem>>, vector<8x128xf32>
      tpu.vector_store %arg9[%c0_29, %c0_30], %44 {strides = array<i32>} : memref<8x128xf32, #tpu.memory_space<vmem>>, vector<8x128xf32>,
    } else {
    }
    %c0 = arith.constant 0 : index
    %c0_1 = arith.constant 0 : index
    %3 = vector.load %arg1[%c0, %c0_1] : memref<32x16xf32, #tpu.memory_space<vmem>>, vector<32x16xf32>
    %c0_2 = arith.constant 0 : index
    %c0_3 = arith.constant 0 : index
    %4 = vector.load %arg2[%c0_2, %c0_3] : memref<16x128xf32, #tpu.memory_space<vmem>>, vector<16x128xf32>
    %cst = arith.constant dense<0.000000e+00> : vector<32x128xf32>
    %5 = tpu.matmul %3, %4, %cst {dimension_numbers = #tpu.dot_dimension_numbers<[1], [0], [0], [1], [0, 0, 1, 1], [], []>} : vector<32x16xf32>, vector<16x128xf32>, vector<32x128xf32> -> vector<32x128xf32>
    %c0_4 = arith.constant 0 : index
    %c0_5 = arith.constant 0 : index
    %6 = vector.load %arg4[%c0_4, %c0_5] : memref<1x128xf32, #tpu.memory_space<vmem>>, vector<1x128xf32>
    %7 = vector.broadcast %6 : vector<1x128xf32> to vector<32x128xf32>
    %8 = arith.addf %5, %7 : vector<32x128xf32>
    %c0_6 = arith.constant 0 : index
    %c0_7 = arith.constant 0 : index
    %9 = vector.load %arg8[%c0_6, %c0_7] : memref<32x128xf32, #tpu.memory_space<vmem>>, vector<32x128xf32>
    tpu.vector_store %arg8[%c0_6, %c0_7], %8 {strides = array<i32>} : memref<32x128xf32, #tpu.memory_space<vmem>>, vector<32x128xf32>,
    %c0_8 = arith.constant 0 : index
    %c0_9 = arith.constant 0 : index
    %10 = vector.load %arg3[%c0_8, %c0_9] : memref<128x128xf32, #tpu.memory_space<vmem>>, vector<128x128xf32>
    %c0_10 = arith.constant 0 : index
    %c0_11 = arith.constant 0 : index
    %11 = vector.load %arg9[%c0_10, %c0_11] : memref<8x128xf32, #tpu.memory_space<vmem>>, vector<8x128xf32>
    %c0_i32_12 = arith.constant 0 : i32
    %c8_i32 = arith.constant 8 : i32
    %12 = arith.muli %c0_i32_12, %c8_i32 : i32
    %13 = tpu.assume_multiple %12, 8 : i32
    %14 = arith.index_cast %13 : i32 to index
    %c0_13 = arith.constant 0 : index
    %15 = vector.load %arg8[%14, %c0_13] : memref<32x128xf32, #tpu.memory_space<vmem>>, vector<8x128xf32>
    %cst_14 = arith.constant dense<0.000000e+00> : vector<8x128xf32>
    %16 = tpu.matmul %11, %10, %cst_14 {dimension_numbers = #tpu.dot_dimension_numbers<[1], [0], [0], [1], [0, 0, 1, 1], [], []>} : vector<8x128xf32>, vector<128x128xf32>, vector<8x128xf32> -> vector<8x128xf32>
    %17 = arith.addf %15, %16 : vector<8x128xf32>
    %18 = math.tanh %17 : vector<8x128xf32>
    %c1_i32 = arith.constant 1 : i32
    %c8_i32_15 = arith.constant 8 : i32
    %19 = arith.muli %c1_i32, %c8_i32_15 : i32
    %20 = tpu.assume_multiple %19, 8 : i32
    %21 = arith.index_cast %20 : i32 to index
    %c0_16 = arith.constant 0 : index
    %22 = vector.load %arg8[%21, %c0_16] : memref<32x128xf32, #tpu.memory_space<vmem>>, vector<8x128xf32>
    %cst_17 = arith.constant dense<0.000000e+00> : vector<8x128xf32>
    %23 = tpu.matmul %18, %10, %cst_17 {dimension_numbers = #tpu.dot_dimension_numbers<[1], [0], [0], [1], [0, 0, 1, 1], [], []>} : vector<8x128xf32>, vector<128x128xf32>, vector<8x128xf32> -> vector<8x128xf32>
    %24 = arith.addf %22, %23 : vector<8x128xf32>
    %25 = math.tanh %24 : vector<8x128xf32>
    %c2_i32 = arith.constant 2 : i32
    %c8_i32_18 = arith.constant 8 : i32
    %26 = arith.muli %c2_i32, %c8_i32_18 : i32
    %27 = tpu.assume_multiple %26, 8 : i32
    %28 = arith.index_cast %27 : i32 to index
    %c0_19 = arith.constant 0 : index
    %29 = vector.load %arg8[%28, %c0_19] : memref<32x128xf32, #tpu.memory_space<vmem>>, vector<8x128xf32>
    %cst_20 = arith.constant dense<0.000000e+00> : vector<8x128xf32>
    %30 = tpu.matmul %25, %10, %cst_20 {dimension_numbers = #tpu.dot_dimension_numbers<[1], [0], [0], [1], [0, 0, 1, 1], [], []>} : vector<8x128xf32>, vector<128x128xf32>, vector<8x128xf32> -> vector<8x128xf32>
    %31 = arith.addf %29, %30 : vector<8x128xf32>
    %32 = math.tanh %31 : vector<8x128xf32>
    %c3_i32 = arith.constant 3 : i32
    %c8_i32_21 = arith.constant 8 : i32
    %33 = arith.muli %c3_i32, %c8_i32_21 : i32
    %34 = tpu.assume_multiple %33, 8 : i32
    %35 = arith.index_cast %34 : i32 to index
    %c0_22 = arith.constant 0 : index
    %36 = vector.load %arg8[%35, %c0_22] : memref<32x128xf32, #tpu.memory_space<vmem>>, vector<8x128xf32>
    %cst_23 = arith.constant dense<0.000000e+00> : vector<8x128xf32>
    %37 = tpu.matmul %32, %10, %cst_23 {dimension_numbers = #tpu.dot_dimension_numbers<[1], [0], [0], [1], [0, 0, 1, 1], [], []>} : vector<8x128xf32>, vector<128x128xf32>, vector<8x128xf32> -> vector<8x128xf32>
    %38 = arith.addf %36, %37 : vector<8x128xf32>
    %39 = math.tanh %38 : vector<8x128xf32>
    %c4_i32 = arith.constant 4 : i32
    %c0_24 = arith.constant 0 : index
    %c0_25 = arith.constant 0 : index
    %40 = vector.load %arg9[%c0_24, %c0_25] : memref<8x128xf32, #tpu.memory_space<vmem>>, vector<8x128xf32>
    tpu.vector_store %arg9[%c0_24, %c0_25], %39 {strides = array<i32>} : memref<8x128xf32, #tpu.memory_space<vmem>>, vector<8x128xf32>,
    %c1_i32_26 = arith.constant 1 : i32
    %41 = arith.cmpi eq, %arg0, %c1_i32_26 : i32
    %42 = arith.extui %41 : i1 to i32
    %c0_i32_27 = arith.constant 0 : i32
    %43 = arith.cmpi ne, %42, %c0_i32_27 : i32
    scf.if %43 {
      %c0_28 = arith.constant 0 : index
      %c0_29 = arith.constant 0 : index
      %44 = vector.load %arg5[%c0_28, %c0_29] : memref<128x128xf32, #tpu.memory_space<vmem>>, vector<128x128xf32>
      %cst_30 = arith.constant dense<0.000000e+00> : vector<8x128xf32>
      %45 = tpu.matmul %39, %44, %cst_30 {dimension_numbers = #tpu.dot_dimension_numbers<[1], [0], [0], [1], [0, 0, 1, 1], [], []>} : vector<8x128xf32>, vector<128x128xf32>, vector<8x128xf32> -> vector<8x128xf32>
      %c0_31 = arith.constant 0 : index
      %c0_32 = arith.constant 0 : index
      %46 = vector.load %arg6[%c0_31, %c0_32] : memref<1x128xf32, #tpu.memory_space<vmem>>, vector<1x128xf32>
      %47 = vector.broadcast %46 : vector<1x128xf32> to vector<8x128xf32>
      %48 = arith.addf %45, %47 : vector<8x128xf32>
      %c0_33 = arith.constant 0 : index
      %c0_34 = arith.constant 0 : index
      %49 = vector.load %arg7[%c0_33, %c0_34] : memref<8x128xf32, #tpu.memory_space<vmem>>, vector<8x128xf32>
      tpu.vector_store %arg7[%c0_33, %c0_34], %48 {strides = array<i32>} : memref<8x128xf32, #tpu.memory_space<vmem>>, vector<8x128xf32>,
    } else {
    }
    return
  }
  func.func @transform_0(%arg0: i32) -> (i32, i32) {
    %c0_i32 = arith.constant 0 : i32
    %c0_i32_0 = arith.constant 0 : i32
    return %arg0, %c0_i32 : i32, i32
  }
  func.func @transform_1(%arg0: i32) -> (i32, i32) {
    %c0_i32 = arith.constant 0 : i32
    %c0_i32_0 = arith.constant 0 : i32
    %c0_i32_1 = arith.constant 0 : i32
    return %c0_i32, %c0_i32_0 : i32, i32
  }
  func.func @transform_2(%arg0: i32) -> (i32, i32) {
    %c0_i32 = arith.constant 0 : i32
    %c0_i32_0 = arith.constant 0 : i32
    %c0_i32_1 = arith.constant 0 : i32
    return %c0_i32, %c0_i32_0 : i32, i32
  }
  func.func @transform_3(%arg0: i32) -> (i32, i32) {
    %c0_i32 = arith.constant 0 : i32
    %c0_i32_0 = arith.constant 0 : i32
    %c0_i32_1 = arith.constant 0 : i32
    return %c0_i32, %c0_i32_0 : i32, i32
  }
  func.func @transform_4(%arg0: i32) -> (i32, i32) {
    %c0_i32 = arith.constant 0 : i32
    %c0_i32_0 = arith.constant 0 : i32
    %c0_i32_1 = arith.constant 0 : i32
    return %c0_i32, %c0_i32_0 : i32, i32
  }
  func.func @transform_5(%arg0: i32) -> (i32, i32) {
    %c0_i32 = arith.constant 0 : i32
    %c0_i32_0 = arith.constant 0 : i32
    %c0_i32_1 = arith.constant 0 : i32
    return %c0_i32, %c0_i32_0 : i32, i32
  }
  func.func @transform_6(%arg0: i32) -> (i32, i32) {
    %c0_i32 = arith.constant 0 : i32
    %c0_i32_0 = arith.constant 0 : i32
    %c0_i32_1 = arith.constant 0 : i32
    return %c0_i32, %c0_i32_0 : i32, i32
  }
}

</mosaic_0001>

<bundles_post_ra>
// kernel: tpu_custom_call.1
= control target key start
LH: loop header
LB: loop body
LE: loop exit
PB: predicated region body
PF: predicated region fallthrough
CT: control target
= control target key end

     0   :  { %11 = vsyncpa [#allocation5], 0  ;;  %s1623_s0 = inlined_call_operand.vmem [shape: f32[64,16], index: 0, kind: input, shape index: {}]   ;;  %s1624_s1 = inlined_call_operand.vmem [shape: f32[16,128], index: 1, kind: input, shape index: {}]   ;;  %s1625_s2 = inlined_call_operand.hbm [shape: f32[128,128], index: 2, kind: input, shape index: {}]   ;;  %s1626_s3 = inlined_call_operand.vmem [shape: f32[1,128], index: 3, kind: input, shape index: {}]   ;;  %s1627_s4 = inlined_call_operand.hbm [shape: f32[128,128], index: 4, kind: input, shape index: {}]   ;;  %s1628_s5 = inlined_call_operand.vmem [shape: f32[1,128], index: 5, kind: input, shape index: {}]   ;;  %s1629_s6 = inlined_call_operand.hbm [shape: f32[8,128], index: 6, kind: output, shape index: {}]  }
   0x1   :  { %12 = vsyncpa [#allocation8], 0 }
   0x2   :  { %13 = vsyncpa [#allocation6], 0  ;;  %s1359_s21 = smov 0  }
   0x3 LB: > { %s1365_s22 = sadd.s32 4294967295, %s1312_s21   ;;  %p870_p0 = scmp.ge.s32.totalorder %s1312_s21, 1  ;;  %s1312_s21 = sphi %s1359_s21, %s19_s21  }
   0x4   : > { %p176_p1 = scmp.lt.s32.totalorder %s1312_s21, 3  ;;  %s1314_s23 = smov [#allocation4]  }
   0x5   : > { %s191_s24 = sshll.u32 %s1314_s23, 4  ;;  %p1186_p4 = scmp.eq.s32.totalorder %s1365_s22, 0  ;;  %s192_s24 = int_to_ptr.vmem [resolvable:$true] %s191_s24 }
   0x6   : > { %p1370_p3 = pnand %p870_p0, %p176_p1  ;;  %s1315_s26 = smov [#allocation7]  }
   0x7   : > { %s207_s27 = sshll.u32 %s1315_s26, 4  ;;  %s1229_s29 = scalar_lea.vmem %s192_s24, 2048  ;;  %s208_s27 = int_to_ptr.vmem [resolvable:$true] %s207_s27 }
   0x8   : > { %p1179_p5 = pneg %p1370_p3  ;;  %p1230_p8 = scmp.ne.s32.totalorder %s192_s24, %s1229_s29 }
   0x9   : > { %p1237_p11 = scmp.lt.s32.totalorder %s192_s24, %s192_s24  ;;  %p1238_p12 = scmp.lt.s32.totalorder %s1229_s29, %s1229_s29 }
   0xa   : > { %p1379_p6 = pnand %p1186_p4, %p1179_p5 }
   0xb   : > { %p1239_p13 = por %p1238_p12, %p1237_p11 }
   0xc   : > { %p1220_p7 = pneg %p1379_p6 }
   0xe   : > { %p1232_p9 = pnand %p1230_p8, %p1220_p7 }
  0x10   : > { %p1233_p10 = pneg %p1232_p9 }
  0x12   : > { %p1240_p0 = pnand %p1239_p13, %p1233_p10 }
  0x14   : > { %1243 = shalt.err (!%p1240_p0)
}
  0x15   : > { %s1316_s30 = smov 128   ;;  %s1317_s7 = smov 8  }
  0x16   : > { %1182 = dma.hbm_to_vmem [thread:$0]  (!%p1379_p6), %s1625_s2, 2048, %s192_s24, [#allocation5], %s1316_s30, %s1316_s30, %s1317_s7  }
  0x17   : > { %s1255_s10 = scalar_lea.vmem %s208_s27, 2048  ;;  %p1263_p9 = scmp.lt.s32.totalorder %s208_s27, %s208_s27 }
  0x18   : > { %p1256_p1 = scmp.ne.s32.totalorder %s208_s27, %s1255_s10  ;;  %p1264_p2 = scmp.lt.s32.totalorder %s1255_s10, %s1255_s10 }
  0x1a   : > { %p1258_p5 = pnand %p1256_p1, %p1220_p7  ;;  %p1265_p11 = por %p1264_p2, %p1263_p9 }
  0x1c   : > { %p1259_p8 = pneg %p1258_p5 }
  0x1e   : > { %p1266_p10 = pnand %p1265_p11, %p1259_p8 }
  0x20   : > { %1269 = shalt.err (!%p1266_p10)
}
  0x21   : > { %1185 = dma.hbm_to_vmem [thread:$0]  (!%p1379_p6), %s1627_s4, 2048, %s208_s27, [#allocation8], %s1316_s30, %s1316_s30, %s1317_s7  }
  0x22   : > { %235 = sbr.rel (%p1370_p3) target bundleno = 1165 (0x48d), region = 44 }
  0x27   : > { %1299 = dma.done.wait (%p1186_p4), [#allocation5], 2048  }
  0x28   : > { %1301 = vsyncadd (%p1186_p4), [#allocation5], 4294965248 }
  0x29   : > { %1303 = dma.done.wait (%p1186_p4), [#allocation8], 2048  }
  0x2a   : > { %1305 = vsyncadd (%p1186_p4), [#allocation8], 4294965248  ;;  %s877_s13 = sshll.u32 %s1365_s22, 2  ;;  %p1632_p3 = scmp.ne.s32.totalorder %s1365_s22, 0 }
  0x2b   : > { %p265_p2 = scmp.lt.s32.totalorder %s877_s13, 7 }
  0x2c   : > { %273 = sbr.rel (%p1632_p3) target bundleno = 51 (0x33), region = 56 }
  0x2d   : > { %s1634_s13 = smov (!%p265_p2, %s877_s13), 7 }
  0x2e   : > { %s878_s14 = sshll.u32 %s1634_s13, 3 }
  0x2f   : > { %s1415_s17 = scalar_lea.vmem %s1623_s0, %s878_s14 }
  0x31   : > { %v1318_v0 = vmov 0.0  }
  0x32   : > { %274 = vst [vmem:[#allocation3] sm:$0xff] %v1318_v0 }
  0x33 PF: > { %v1419_v1 = vld [vmem:[#allocation4 + $0x78] sm:$0xff]  ;;  %v1319_v2 = vmov 0.0   ;;  %v1422_v3 = vld [vmem:[#allocation4 + $0x70] sm:$0xff]  ;;  %vm1320_vm0 = vmmov 0   ;;  %v1428_v4 = vld [vmem:[#allocation4 + $0x68] sm:$0xff]  ;;  %vm288_vm1 = vcmask 130048  }
  0x34   : > { %992 = vmatprep.subr.mxu1 %v1319_v2  ;;  %1024 = vmatprep.mubr.msk.f32.mxu1 %vm1320_vm0, %v1319_v2  ;;  %v280_v5 = vld [vmem:[%s1624_s1 + $0x8] sm:$0xff]  ;;  %v279_v6 = vld [vmem:[%s1624_s1] sm:$0xff]  ;;  %v1449_v11 = vld [vmem:[#allocation4 + $0x50] sm:$0xff]  ;;  %p885_p4 = scmp.ne.s32.totalorder %s1365_s22, 1 }
  0x35   : > { %993 = vmatpush3.msra.mxu1 %v1419_v1  ;;  %982 = vmatprep.subr.mxu0 %v280_v5  ;;  %v1438_v7 = vld [vmem:[#allocation4 + $0x60] sm:$0xff]  ;;  %v275_v8 = vld [vmem:[%s1415_s17] sm:$0xff]  ;;  %v1455_v12 = vld [vmem:[#allocation4 + $0x48] sm:$0xff] }
  0x36   : > { %994 = vmatprep.subr.mxu1 %v1319_v2  ;;  %983 = vmatpush3.msra.mxu0 %v280_v5  ;;  %v276_v9 = vld [vmem:[%s1415_s17 + $0x8] sm:$0xff]  ;;  %v1444_v10 = vld [vmem:[#allocation4 + $0x58] sm:$0xff]  ;;  %v1473_v15 = vld [vmem:[#allocation4 + $0x30] sm:$0xff] }
  0x37   : > { %995 = vmatpush3.msra.mxu1 %v1422_v3  ;;  %984 = vmatprep.subr.mxu0 %v279_v6  ;;  %v1461_v13 = vld [vmem:[#allocation4 + $0x40] sm:$0xff]  ;;  %v1467_v14 = vld [vmem:[#allocation4 + $0x38] sm:$0xff]  ;;  %v1479_v16 = vld [vmem:[#allocation4 + $0x28] sm:$0xff] }
  0x38   : > { %996 = vmatprep.subr.mxu1 %v1319_v2  ;;  %985 = vmatpush3.msra.mxu0 %v279_v6  ;;  %v1485_v17 = vld [vmem:[#allocation4 + $0x20] sm:$0xff]  ;;  %v1491_v18 = vld [vmem:[#allocation4 + $0x18] sm:$0xff]  ;;  %v1497_v19 = vld [vmem:[#allocation4 + $0x10] sm:$0xff] }
  0x39   : > { %997 = vmatpush3.msra.mxu1 %v1428_v4  ;;  %986 = vmatprep.mubr.msk.f32.mxu0 %vm288_vm1, %v275_v8  ;;  %v1503_v20 = vld [vmem:[#allocation4 + $0x8] sm:$0xff]  ;;  %v1509_v21 = vld [vmem:[#allocation4] sm:$0xff]  ;;  %v406_v22 = vld [vmem:[#allocation3] sm:$0xff] }
  0x3a   : > { %998 = vmatprep.subr.mxu1 %v1319_v2  ;;  %987 = vmatmul.mubr.msk.f32.vlgmr.msra.gmra.mxu0 %vm288_vm1, %v276_v9  ;;  %v277_v23 = vld [vmem:[%s1415_s17 + $0x10] sm:$0xff]  ;;  %v278_v24 = vld [vmem:[%s1415_s17 + $0x18] sm:$0xff]  ;;  %v880_v26 = vld [vmem:[%s1626_s3] ss:$0 sm:$0xff] }
  0x3b   : > { %999 = vmatpush3.msra.mxu1 %v1438_v7  ;;  %1027 = vmatprep.subr.mxu0 %v1319_v2 }
  0x3c   : > { %1000 = vmatprep.subr.mxu1 %v1319_v2  ;;  %1028 = vmatpush3.msra.mxu0 %v1419_v1 }
  0x3d   : > { %1001 = vmatpush3.msra.mxu1 %v1444_v10  ;;  %1029 = vmatprep.subr.mxu0 %v1319_v2 }
  0x3e   : > { %1002 = vmatprep.subr.mxu1 %v1319_v2  ;;  %1030 = vmatpush3.msra.mxu0 %v1422_v3 }
  0x3f   : > { %1003 = vmatpush3.msra.mxu1 %v1449_v11  ;;  %1031 = vmatprep.subr.mxu0 %v1319_v2 }
  0x40   : > { %1004 = vmatprep.subr.mxu1 %v1319_v2  ;;  %1032 = vmatpush3.msra.mxu0 %v1428_v4 }
  0x41   : > { %1005 = vmatpush3.msra.mxu1 %v1455_v12  ;;  %1033 = vmatprep.subr.mxu0 %v1319_v2 }
  0x42   : > { %1006 = vmatprep.subr.mxu1 %v1319_v2  ;;  %1034 = vmatpush3.msra.mxu0 %v1438_v7 }
  0x43   : > { %1007 = vmatpush3.msra.mxu1 %v1461_v13  ;;  %1035 = vmatprep.subr.mxu0 %v1319_v2 }
  0x44   : > { %1008 = vmatprep.subr.mxu1 %v1319_v2  ;;  %1036 = vmatpush3.msra.mxu0 %v1444_v10 }
  0x45   : > { %1009 = vmatpush3.msra.mxu1 %v1467_v14  ;;  %1037 = vmatprep.subr.mxu0 %v1319_v2 }
  0x46   : > { %1010 = vmatprep.subr.mxu1 %v1319_v2  ;;  %1038 = vmatpush3.msra.mxu0 %v1449_v11 }
  0x47   : > { %1011 = vmatpush3.msra.mxu1 %v1473_v15  ;;  %1039 = vmatprep.subr.mxu0 %v1319_v2 }
  0x48   : > { %1012 = vmatprep.subr.mxu1 %v1319_v2  ;;  %1040 = vmatpush3.msra.mxu0 %v1455_v12 }
  0x49   : > { %1013 = vmatpush3.msra.mxu1 %v1479_v16  ;;  %1041 = vmatprep.subr.mxu0 %v1319_v2 }
  0x4a   : > { %1014 = vmatprep.subr.mxu1 %v1319_v2  ;;  %1042 = vmatpush3.msra.mxu0 %v1461_v13 }
  0x4b   : > { %1015 = vmatpush3.msra.mxu1 %v1485_v17  ;;  %1043 = vmatprep.subr.mxu0 %v1319_v2 }
  0x4c   : > { %1016 = vmatprep.subr.mxu1 %v1319_v2  ;;  %1044 = vmatpush3.msra.mxu0 %v1467_v14 }
  0x4d   : > { %1017 = vmatpush3.msra.mxu1 %v1491_v18  ;;  %1045 = vmatprep.subr.mxu0 %v1319_v2 }
  0x4e   : > { %1018 = vmatprep.subr.mxu1 %v1319_v2  ;;  %1046 = vmatpush3.msra.mxu0 %v1473_v15 }
  0x4f   : > { %1019 = vmatpush3.msra.mxu1 %v1497_v19  ;;  %1047 = vmatprep.subr.mxu0 %v1319_v2 }
  0x50   : > { %1020 = vmatprep.subr.mxu1 %v1319_v2  ;;  %1048 = vmatpush3.msra.mxu0 %v1479_v16 }
  0x51   : > { %1021 = vmatpush3.msra.mxu1 %v1503_v20  ;;  %1049 = vmatprep.subr.mxu0 %v1319_v2 }
  0x52   : > { %1022 = vmatprep.subr.mxu1 %v1319_v2  ;;  %1050 = vmatpush3.msra.mxu0 %v1485_v17 }
  0x53   : > { %1023 = vmatpush3.msra.mxu1 %v1509_v21  ;;  %1051 = vmatprep.subr.mxu0 %v1319_v2 }
  0x54   : > { %1025 = vmatmul.mubr.f32.vlgmr.msra.gmra.mxu1 %v406_v22  ;;  %1062 = vmatprep.subr.mxu1 %v1319_v2 }
  0x55   : > { %1052 = vmatpush3.msra.mxu0 %v1491_v18  ;;  %1063 = vmatpush3.msra.mxu1 %v1419_v1 }
  0x56   : > { %1053 = vmatprep.subr.mxu0 %v1319_v2  ;;  %1064 = vmatprep.subr.mxu1 %v1319_v2 }
  0x57   : > { %1054 = vmatpush3.msra.mxu0 %v1497_v19  ;;  %1065 = vmatpush3.msra.mxu1 %v1422_v3 }
  0x58   : > { %1055 = vmatprep.subr.mxu0 %v1319_v2  ;;  %1066 = vmatprep.subr.mxu1 %v1319_v2 }
  0x59   : > { %1056 = vmatpush3.msra.mxu0 %v1503_v20  ;;  %1067 = vmatpush3.msra.mxu1 %v1428_v4 }
  0x5a   : > { %1057 = vmatprep.subr.mxu0 %v1319_v2  ;;  %1068 = vmatprep.subr.mxu1 %v1319_v2 }
  0x5b   : > { %1058 = vmatpush3.msra.mxu0 %v1509_v21  ;;  %1069 = vmatpush3.msra.mxu1 %v1438_v7 }
  0x5c   : > { %1070 = vmatprep.subr.mxu1 %v1319_v2  ;;  %1094 = vmatprep.mubr.msk.f32.mxu1 %vm1320_vm0, %v1319_v2 }
  0x5d   : > { %1071 = vmatpush3.msra.mxu1 %v1444_v10  ;;  %1097 = vmatprep.subr.mxu0 %v1319_v2 }
  0x5e   : > { %1072 = vmatprep.subr.mxu1 %v1319_v2  ;;  %989 = vmatprep.mubr.msk.f32.mxu0 %vm288_vm1, %v277_v23 }
  0x5f   : > { %1073 = vmatpush3.msra.mxu1 %v1449_v11  ;;  %990 = vmatmul.mubr.msk.f32.gmra.mxu0 %vm288_vm1, %v278_v24 }
  0x60   : > { %1074 = vmatprep.subr.mxu1 %v1319_v2  ;;  %1059 = vmatprep.mubr.msk.f32.mxu0 %vm1320_vm0, %v1319_v2 }
  0x61   : > { %1075 = vmatpush3.msra.mxu1 %v1455_v12 }
  0x62   : > { %1076 = vmatprep.subr.mxu1 %v1319_v2 }
  0x63   : > { %1077 = vmatpush3.msra.mxu1 %v1461_v13 }
  0x64   : > { %1078 = vmatprep.subr.mxu1 %v1319_v2 }
  0x65   : > { %1079 = vmatpush3.msra.mxu1 %v1467_v14 }
  0x66   : > { %1080 = vmatprep.subr.mxu1 %v1319_v2 }
  0x67   : > { %1081 = vmatpush3.msra.mxu1 %v1473_v15 }
  0x68   : > { %1082 = vmatprep.subr.mxu1 %v1319_v2 }
  0x69   : > { %1083 = vmatpush3.msra.mxu1 %v1479_v16 }
  0x6a   : > { %1084 = vmatprep.subr.mxu1 %v1319_v2 }
  0x6b   : > { %1085 = vmatpush3.msra.mxu1 %v1485_v17 }
  0x6c   : > { %1086 = vmatprep.subr.mxu1 %v1319_v2 }
  0x6d   : > { %1087 = vmatpush3.msra.mxu1 %v1491_v18 }
  0x6e   : > { %1088 = vmatprep.subr.mxu1 %v1319_v2 }
  0x6f   : > { %1089 = vmatpush3.msra.mxu1 %v1497_v19 }
  0x70   : > { %1090 = vmatprep.subr.mxu1 %v1319_v2 }
  0x71   : > { %1091 = vmatpush3.msra.mxu1 %v1503_v20 }
  0x72   : > { %1092 = vmatprep.subr.mxu1 %v1319_v2 }
  0x73   : > { %1093 = vmatpush3.msra.mxu1 %v1509_v21 }
  0xfa   : > { %v988_v25 = vpop.f32.mrf.mxu0 }
  0xfb   : > { %v373_v35 = vadd.f32 %v988_v25, %v880_v26 }
  0xfc   : > { %v367_v27 = vpop.f32.mrf.mxu0 }
  0xfd   : > { %v368_v28 = vadd.f32 %v880_v26, %v367_v27 }
 0x114   : > { %v474_v29 = vpop.f32.mrf.mxu1 }
 0x115   : > { %v478_v30 = vadd.f32 %v474_v29, %v368_v28 }
 0x116   : > { %v1026_v31 = vpop.f32.mrf.mxu1 }
 0x117   : > { %1210 = vtanh.f32 %v478_v30 }
 0x11f   : > { %v991_v33 = vpop.f32.mrf.mxu0 }
 0x120   : > { %v383_v45 = vadd.f32 %v991_v33, %v880_v26 }
 0x121   : > { %v377_v34 = vpop.f32.mrf.mxu0 }
 0x122   : > { %v378_v40 = vadd.f32 %v880_v26, %v377_v34 }
 0x124   : > { %v1211_v32 = vpop.eup %1210 }
 0x125   : > { %1060 = vmatmul.mubr.f32.vlgmr.msra.gmra.mxu0 %v1211_v32 }
 0x126   : > { %1098 = vmatpush3.msra.mxu0 %v1419_v1  ;;  %1129 = vmatprep.mubr.msk.f32.mxu0 %vm1320_vm0, %v1319_v2 }
 0x127   : > { %1099 = vmatprep.subr.mxu0 %v1319_v2 }
 0x128   : > { %1100 = vmatpush3.msra.mxu0 %v1422_v3 }
 0x129   : > { %1101 = vmatprep.subr.mxu0 %v1319_v2 }
 0x12a   : > { %1102 = vmatpush3.msra.mxu0 %v1428_v4 }
 0x12b   : > { %1103 = vmatprep.subr.mxu0 %v1319_v2 }
 0x12c   : > { %1104 = vmatpush3.msra.mxu0 %v1438_v7 }
 0x12d   : > { %1105 = vmatprep.subr.mxu0 %v1319_v2 }
 0x12e   : > { %1106 = vmatpush3.msra.mxu0 %v1444_v10 }
 0x12f   : > { %1107 = vmatprep.subr.mxu0 %v1319_v2 }
 0x130   : > { %1108 = vmatpush3.msra.mxu0 %v1449_v11 }
 0x131   : > { %1109 = vmatprep.subr.mxu0 %v1319_v2 }
 0x132   : > { %1110 = vmatpush3.msra.mxu0 %v1455_v12 }
 0x133   : > { %1111 = vmatprep.subr.mxu0 %v1319_v2 }
 0x134   : > { %1112 = vmatpush3.msra.mxu0 %v1461_v13 }
 0x135   : > { %1113 = vmatprep.subr.mxu0 %v1319_v2 }
 0x136   : > { %1114 = vmatpush3.msra.mxu0 %v1467_v14 }
 0x137   : > { %1115 = vmatprep.subr.mxu0 %v1319_v2 }
 0x138   : > { %1116 = vmatpush3.msra.mxu0 %v1473_v15 }
 0x139   : > { %1117 = vmatprep.subr.mxu0 %v1319_v2 }
 0x13a   : > { %1118 = vmatpush3.msra.mxu0 %v1479_v16 }
 0x13b   : > { %1119 = vmatprep.subr.mxu0 %v1319_v2 }
 0x13c   : > { %1120 = vmatpush3.msra.mxu0 %v1485_v17 }
 0x13d   : > { %1121 = vmatprep.subr.mxu0 %v1319_v2 }
 0x13e   : > { %1122 = vmatpush3.msra.mxu0 %v1491_v18 }
 0x13f   : > { %1123 = vmatprep.subr.mxu0 %v1319_v2 }
 0x140   : > { %1124 = vmatpush3.msra.mxu0 %v1497_v19 }
 0x141   : > { %1125 = vmatprep.subr.mxu0 %v1319_v2 }
 0x142   : > { %1126 = vmatpush3.msra.mxu0 %v1503_v20 }
 0x143   : > { %1127 = vmatprep.subr.mxu0 %v1319_v2 }
 0x144   : > { %1128 = vmatpush3.msra.mxu0 %v1509_v21 }
 0x1e5   : > { %v548_v36 = vpop.f32.mrf.mxu0 }
 0x1e6   : > { %v552_v37 = vadd.f32 %v548_v36, %v373_v35 }
 0x1e7   : > { %v1061_v38 = vpop.f32.mrf.mxu0 }
 0x1e8   : > { %1212 = vtanh.f32 %v552_v37 }
 0x1f5   : > { %v1213_v39 = vpop.eup %1212 }
 0x1f6   : > { %1095 = vmatmul.mubr.f32.vlgmr.msra.gmra.mxu1 %v1213_v39 }
 0x2b6   : > { %v622_v41 = vpop.f32.mrf.mxu1 }
 0x2b7   : > { %v626_v42 = vadd.f32 %v622_v41, %v378_v40 }
 0x2b8   : > { %v1096_v43 = vpop.f32.mrf.mxu1 }
 0x2b9   : > { %1214 = vtanh.f32 %v626_v42 }
 0x2c6   : > { %v1215_v44 = vpop.eup %1214 }
 0x2c7   : > { %1130 = vmatmul.mubr.f32.vlgmr.msra.gmra.mxu0 %v1215_v44 }
 0x387   : > { %v696_v46 = vpop.f32.mrf.mxu0 }
 0x388   : > { %v700_v47 = vadd.f32 %v696_v46, %v383_v45 }
 0x389   : > { %v1131_v48 = vpop.f32.mrf.mxu0 }
 0x38a   : > { %1216 = vtanh.f32 %v700_v47 }
 0x394   : > { %706 = sbr.rel (%p885_p4) target bundleno = 1150 (0x47e), region = 60 }
 0x397   : > { %v1217_v49 = vpop.eup %1216 }
 0x398   : > { %702 = vst [vmem:[#allocation3] sm:$0xff] %v1217_v49 }
 0x399   : > { %v722_v50 = vld [vmem:[#allocation7 + $0x78] sm:$0xff]  ;;  %v1321_v51 = vmov 0.0   ;;  %v721_v52 = vld [vmem:[#allocation7 + $0x70] sm:$0xff]  ;;  %vm1322_vm2 = vmmov 0   ;;  %v720_v53 = vld [vmem:[#allocation7 + $0x68] sm:$0xff] }
 0x39a   : > { %1132 = vmatprep.subr.mxu0 %v1321_v51  ;;  %1164 = vmatprep.mubr.msk.f32.mxu0 %vm1322_vm2, %v1321_v51  ;;  %v719_v54 = vld [vmem:[#allocation7 + $0x60] sm:$0xff]  ;;  %v718_v55 = vld [vmem:[#allocation7 + $0x58] sm:$0xff]  ;;  %v717_v56 = vld [vmem:[#allocation7 + $0x50] sm:$0xff] }
 0x39b   : > { %1133 = vmatpush3.msra.mxu0 %v722_v50  ;;  %v716_v57 = vld [vmem:[#allocation7 + $0x48] sm:$0xff]  ;;  %v715_v58 = vld [vmem:[#allocation7 + $0x40] sm:$0xff]  ;;  %v714_v59 = vld [vmem:[#allocation7 + $0x38] sm:$0xff] }
 0x39c   : > { %1134 = vmatprep.subr.mxu0 %v1321_v51  ;;  %v713_v60 = vld [vmem:[#allocation7 + $0x30] sm:$0xff]  ;;  %v712_v61 = vld [vmem:[#allocation7 + $0x28] sm:$0xff]  ;;  %v711_v62 = vld [vmem:[#allocation7 + $0x20] sm:$0xff] }
 0x39d   : > { %1135 = vmatpush3.msra.mxu0 %v721_v52  ;;  %v710_v63 = vld [vmem:[#allocation7 + $0x18] sm:$0xff]  ;;  %v709_v0 = vld [vmem:[#allocation7 + $0x10] sm:$0xff]  ;;  %v708_v1 = vld [vmem:[#allocation7 + $0x8] sm:$0xff] }
 0x39e   : > { %1136 = vmatprep.subr.mxu0 %v1321_v51  ;;  %v707_v2 = vld [vmem:[#allocation7] sm:$0xff]  ;;  %v886_v3 = vld [vmem:[%s1628_s5] ss:$0 sm:$0xff] }
 0x39f   : > { %1137 = vmatpush3.msra.mxu0 %v720_v53 }
 0x3a0   : > { %1138 = vmatprep.subr.mxu0 %v1321_v51 }
 0x3a1   : > { %1139 = vmatpush3.msra.mxu0 %v719_v54 }
 0x3a2   : > { %1140 = vmatprep.subr.mxu0 %v1321_v51 }
 0x3a3   : > { %1141 = vmatpush3.msra.mxu0 %v718_v55 }
 0x3a4   : > { %1142 = vmatprep.subr.mxu0 %v1321_v51 }
 0x3a5   : > { %1143 = vmatpush3.msra.mxu0 %v717_v56 }
 0x3a6   : > { %1144 = vmatprep.subr.mxu0 %v1321_v51 }
 0x3a7   : > { %1145 = vmatpush3.msra.mxu0 %v716_v57 }
 0x3a8   : > { %1146 = vmatprep.subr.mxu0 %v1321_v51 }
 0x3a9   : > { %1147 = vmatpush3.msra.mxu0 %v715_v58 }
 0x3aa   : > { %1148 = vmatprep.subr.mxu0 %v1321_v51 }
 0x3ab   : > { %1149 = vmatpush3.msra.mxu0 %v714_v59 }
 0x3ac   : > { %1150 = vmatprep.subr.mxu0 %v1321_v51 }
 0x3ad   : > { %1151 = vmatpush3.msra.mxu0 %v713_v60 }
 0x3ae   : > { %1152 = vmatprep.subr.mxu0 %v1321_v51 }
 0x3af   : > { %1153 = vmatpush3.msra.mxu0 %v712_v61 }
 0x3b0   : > { %1154 = vmatprep.subr.mxu0 %v1321_v51 }
 0x3b1   : > { %1155 = vmatpush3.msra.mxu0 %v711_v62 }
 0x3b2   : > { %1156 = vmatprep.subr.mxu0 %v1321_v51 }
 0x3b3   : > { %1157 = vmatpush3.msra.mxu0 %v710_v63 }
 0x3b4   : > { %1158 = vmatprep.subr.mxu0 %v1321_v51 }
 0x3b5   : > { %1159 = vmatpush3.msra.mxu0 %v709_v0 }
 0x3b6   : > { %1160 = vmatprep.subr.mxu0 %v1321_v51 }
 0x3b7   : > { %1161 = vmatpush3.msra.mxu0 %v708_v1 }
 0x3b8   : > { %1162 = vmatprep.subr.mxu0 %v1321_v51 }
 0x3b9   : > { %1163 = vmatpush3.msra.mxu0 %v707_v2 }
 0x3ba   : > { %1165 = vmatmul.mubr.f32.vlgmr.msra.gmra.mxu0 %v1217_v49 }
 0x47a   : > { %v796_v4 = vpop.f32.mrf.mxu0 }
 0x47b   : > { %v797_v5 = vadd.f32 %v886_v3, %v796_v4 }
 0x47c   : > { %v1166_v6 = vpop.f32.mrf.mxu0 }
 0x47d   : > { %800 = vst [vmem:[#allocation9] sm:$0xff] %v797_v5 }
 0x47e PF: > { %p1190_p6 = scmp.eq.s32.totalorder %s1365_s22, 1  ;;  %s1323_s28 = smov [#allocation9]  }
 0x47f   : > { %s808_s29 = sshll.u32 %s1323_s28, 4  ;;  %s809_s29 = int_to_ptr.vmem [resolvable:$true] %s808_s29 }
 0x480   : > { %s1270_s30 = scalar_lea.vmem %s809_s29, 128  ;;  %p1277_p0 = scmp.lt.s32.totalorder %s809_s29, %s809_s29 }
 0x481   : > { %p1271_p7 = scmp.ne.s32.totalorder %s809_s29, %s1270_s30  ;;  %p1278_p1 = scmp.lt.s32.totalorder %s1270_s30, %s1270_s30 }
 0x483   : > { %p1272_p12 = pnand %p1271_p7, %p1190_p6  ;;  %p1279_p5 = por %p1278_p1, %p1277_p0 }
 0x485   : > { %p1273_p13 = pneg %p1272_p12 }
 0x487   : > { %p1280_p8 = pnand %p1279_p5, %p1273_p13 }
 0x489   : > { %1283 = shalt.err (!%p1280_p8)
}
 0x48a   : > { %1176 = dma.vmem_to_hbm [thread:$0]  (%p1190_p6), %s809_s29, 128, %s1629_s6, [#allocation6]  }
 0x48b   : > { %1307 = dma.done.wait (%p1190_p6), [#allocation6], 128  }
 0x48c   : > { %1309 = vsyncadd (%p1190_p6), [#allocation6], 4294967168 }
 0x48d PF: > { %s19_s21 = sadd.s32 1, %s1312_s21  }
 0x48e   : > { %p16_p9 = scmp.ge.s32.totalorder %s19_s21, 4  }
 0x490   :  { %18 = sbr.rel (!%p16_p9) target bundleno = 3 (0x3), region = 91 }
 0x495   :  { %821 = vsyncpa [#allocation5], 1 }
 0x496   :  { %823 = vsyncpa [#allocation5 + $0x1], 1 }
 0x497   :  { %824 = vsyncpa [#allocation8], 1 }
 0x498   :  { %825 = vsyncpa [#allocation6], 1 }
 0x499   :  { %827 = vsyncpa [#allocation6 + $0x1], 1 }

</bundles_post_ra>
